<compile_context>
chip_gen: v5e
topology: v5e:2x2
jax: 0.10.0
libtpu: 0.0.40
codegen_flags: <defaults>
</compile_context>

<pallas_src>
import math
import functools

import jax
import jax.numpy as jnp
from jax.experimental import pallas as pl
from jax.experimental.pallas import tpu as pltpu


def _pick_tile(dim, targets):
    """Largest target tile that evenly divides `dim`, else the full extent."""
    for t in targets:
        if dim >= t and dim % t == 0:
            return t
    return dim


def _kv_tiling(T):
    """KV tile size and padded KV length (padded columns are causally masked)."""
    for t in (2048, 1024, 512):
        if T % t == 0:
            return t, T
    if T > 512:
        tkv = 512
        return tkv, pl.cdiv(T, tkv) * tkv
    for t in (256, 128):
        if T % t == 0:
            return t, T
    return T, T


# ----------------------------- linear ------------------------------------- #

def _linear_kernel_bf16_out(x_ref, w_ref, b_ref, o_ref, acc_ref):
    @pl.when(pl.program_id(2) == 0)
    def _init():
        acc_ref[...] = jnp.zeros_like(acc_ref)

    acc_ref[...] += jnp.dot(x_ref[...].astype(jnp.bfloat16), w_ref[...],
                            preferred_element_type=jnp.float32)

    # bias add + downcast + store only on the final K step
    @pl.when(pl.program_id(2) == pl.num_programs(2) - 1)
    def _finalize():
        o_ref[...] = (acc_ref[...] + b_ref[...]).astype(o_ref.dtype)


def _linear_kernel_f32_out(x_ref, w_ref, b_ref, o_ref):
    # Output block is resident across the K axis: init it with the bias and
    # accumulate into it directly (no VMEM scratch, no finalize copy).
    @pl.when(pl.program_id(2) == 0)
    def _init():
        o_ref[...] = jnp.broadcast_to(b_ref[...], o_ref.shape)

    o_ref[...] += jnp.dot(x_ref[...].astype(jnp.bfloat16), w_ref[...],
                          preferred_element_type=jnp.float32)


def linear(x, w, b, out_dtype):
    """LinearTransposed: y = x @ w + b with w of shape [in, out] (bf16 weights)."""
    M, K = x.shape
    K2, N = w.shape
    assert K == K2
    tm = _pick_tile(M, (256, 128))
    tn = _pick_tile(N, (512, 256, 128))
    tk = _pick_tile(K, (512, 256, 128))
    grid = (M // tm, N // tn, K // tk)

    bb = b.reshape(1, N).astype(jnp.float32)

    if out_dtype == jnp.float32:
        kernel = _linear_kernel_f32_out
        scratch = []
    else:
        kernel = _linear_kernel_bf16_out
        scratch = [pltpu.VMEM((tm, tn), jnp.float32)]

    return pl.pallas_call(
        kernel,
        out_shape=jax.ShapeDtypeStruct((M, N), out_dtype),
        grid=grid,
        in_specs=[
            pl.BlockSpec((tm, tk), lambda i, j, k: (i, k)),
            pl.BlockSpec((tk, tn), lambda i, j, k: (k, j)),
            pl.BlockSpec((1, tn), lambda i, j, k: (0, j)),
        ],
        out_specs=pl.BlockSpec((tm, tn), lambda i, j, k: (i, j)),
        scratch_shapes=scratch,
        compiler_params=pltpu.CompilerParams(
            dimension_semantics=("parallel", "parallel", "arbitrary")),
    )(x, w, bb)


# ------------------------ flash-style attention ---------------------------- #

def _flash_attn_kernel(prev_ref, q_ref, k_ref, v_ref, o_ref,
                       m_sc, l_sc, acc_sc, *, tq, tkv):
    qi = pl.program_id(1)
    kv = pl.program_id(2)
    prev = prev_ref[0]                    # valid cache length (SMEM scalar)

    @pl.when(kv == 0)
    def _init():
        m_sc[...] = jnp.full_like(m_sc, -jnp.inf)
        l_sc[...] = jnp.zeros_like(l_sc)
        acc_sc[...] = jnp.zeros_like(acc_sc)

    # Skip KV tiles that lie entirely above the causal frontier of this q tile.
    # (kv == 0 is never skipped, so every row sees at least one real column and
    #  the -inf running max is always replaced before it can poison l/acc.)
    @pl.when(kv * tkv <= prev + (qi + 1) * tq - 1)
    def _compute():
        q = q_ref[0]          # (tq, D)  bf16, scale pre-folded into c_attn q cols
        k = k_ref[0]          # (tkv, D) bf16
        v = v_ref[0]          # (tkv, D) bf16

        # scores: contract last dims directly (no k.T materialization / XLU pass)
        s = jax.lax.dot_general(q, k, (((1,), (1,)), ((), ())),
                                preferred_element_type=jnp.float32)  # (tq, tkv)

        # causal mask: local column index vs per-row visible limit (covers
        # both the causal frontier and any zero-padded cache columns)
        row = jax.lax.broadcasted_iota(jnp.int32, (tq, 1), 0)
        col = jax.lax.broadcasted_iota(jnp.int32, (tq, tkv), 1)
        limit = row + (prev + qi * tq - kv * tkv)                    # (tq, 1)
        s = jnp.where(col <= limit, s, -1e30)

        # online softmax update
        m_prev = m_sc[...]
        m_new = jnp.maximum(m_prev, jnp.max(s, axis=-1, keepdims=True))
        alpha = jnp.exp(m_prev - m_new)
        p = jnp.exp(s - m_new)
        l_sc[...] = alpha * l_sc[...] + jnp.sum(p, axis=-1, keepdims=True)
        acc_sc[...] = alpha * acc_sc[...] + jax.lax.dot_general(
            p.astype(v.dtype), v, (((1,), (0,)), ((), ())),
            preferred_element_type=jnp.float32)
        m_sc[...] = m_new

    @pl.when(kv == pl.num_programs(2) - 1)
    def _finalize():
        o_ref[0] = (acc_sc[...] * pl.reciprocal(l_sc[...], approx=True)
                    ).astype(o_ref.dtype)


def flash_attention(q, kk, vv, prev_seq, out_dtype=jnp.bfloat16):
    # q: [H, S, D] (bf16, scale folded into c_attn), kk/vv: [H, T, D] (bf16)
    H, S, D = q.shape
    T = kk.shape[1]

    tq = _pick_tile(S, (256, 128))
    tkv, T_pad = _kv_tiling(T)
    if T_pad != T:
        pad = ((0, 0), (0, T_pad - T), (0, 0))
        kk = jnp.pad(kk, pad)
        vv = jnp.pad(vv, pad)

    n_q = S // tq
    n_kv = T_pad // tkv
    prev = jnp.asarray([prev_seq], jnp.int32)

    return pl.pallas_call(
        functools.partial(_flash_attn_kernel, tq=tq, tkv=tkv),
        out_shape=jax.ShapeDtypeStruct((H, S, D), out_dtype),
        grid_spec=pltpu.PrefetchScalarGridSpec(
            num_scalar_prefetch=1,
            grid=(H, n_q, n_kv),
            in_specs=[
                pl.BlockSpec((1, tq, D), lambda h, qi, kv, ps: (h, qi, 0)),
                pl.BlockSpec((1, tkv, D), lambda h, qi, kv, ps: (h, kv, 0)),
                pl.BlockSpec((1, tkv, D), lambda h, qi, kv, ps: (h, kv, 0)),
            ],
            out_specs=pl.BlockSpec((1, tq, D), lambda h, qi, kv, ps: (h, qi, 0)),
            scratch_shapes=[
                pltpu.VMEM((tq, 1), jnp.float32),   # running max m
                pltpu.VMEM((tq, 1), jnp.float32),   # running denom l
                pltpu.VMEM((tq, D), jnp.float32),   # output accumulator
            ]),
        compiler_params=pltpu.CompilerParams(
            dimension_semantics=("parallel", "parallel", "arbitrary")),
    )(prev, q, kk, vv)


# ----------------------------- GPT2Attention -------------------------------- #

def init_params(key, hidden):
    ks = jax.random.split(key, 4)
    s = 0.02
    return {
        "c_attn_w": s * jax.random.normal(ks[0], (hidden, 3 * hidden), jnp.float32),
        "c_attn_b": s * jax.random.normal(ks[1], (3 * hidden,), jnp.float32),
        "c_proj_w": s * jax.random.normal(ks[2], (hidden, hidden), jnp.float32),
        "c_proj_b": s * jax.random.normal(ks[3], (hidden,), jnp.float32),
    }


def prepare_params(params, num_heads):
    """One-time: cast weights to bf16 and fold 1/sqrt(head_dim) into the q columns."""
    hidden = params["c_proj_w"].shape[0]
    head_dim = hidden // num_heads
    scale = 1.0 / math.sqrt(head_dim)
    col_scale = jnp.concatenate(
        [jnp.full((hidden,), scale, jnp.float32),
         jnp.ones((2 * hidden,), jnp.float32)])
    return {
        "c_attn_w": (params["c_attn_w"] * col_scale[None, :]).astype(jnp.bfloat16),
        "c_attn_b": (params["c_attn_b"] * col_scale).astype(jnp.float32),
        "c_proj_w": params["c_proj_w"].astype(jnp.bfloat16),
        "c_proj_b": params["c_proj_b"].astype(jnp.float32),
    }


def gpt2_attention(prepared, hidden_states, last_key, last_value, num_heads):
    S, Hdim = hidden_states.shape
    D = Hdim // num_heads
    prev_seq = last_key.shape[1]

    # qkv emitted directly in bf16 (f32 accumulation inside the kernel);
    # q columns already carry the 1/sqrt(head_dim) scale.
    qkv = linear(hidden_states, prepared["c_attn_w"], prepared["c_attn_b"],
                 out_dtype=jnp.bfloat16)                          # [S, 3H] bf16
    q, k, v = jnp.split(qkv, 3, axis=-1)
    # [S, H] -> [nh, S, hd]  (head_dim < 128 column slices are not (8,128)-legal
    # BlockSpec blocks, so this layout glue stays in XLA)
    q = q.reshape(S, num_heads, D).transpose(1, 0, 2)
    k = k.reshape(S, num_heads, D).transpose(1, 0, 2)
    v = v.reshape(S, num_heads, D).transpose(1, 0, 2)

    # TODO(synk): replace the O(T) concatenate with a persistent bf16
    # [nh, max_T, hd] KV cache written in place via input_output_aliases at the
    # call site; that also removes the per-call last_key/value bf16 cast.
    kk = jnp.concatenate([last_key.astype(jnp.bfloat16), k], axis=1)
    vv = jnp.concatenate([last_value.astype(jnp.bfloat16), v], axis=1)

    attn = flash_attention(q, kk, vv, prev_seq)                   # [nh, S, hd] bf16
    attn = attn.transpose(1, 0, 2).reshape(S, Hdim)
    out = linear(attn, prepared["c_proj_w"], prepared["c_proj_b"],
                 out_dtype=jnp.float32)                           # [S, H] f32
    # returned k/v follow the module's (input-dtype) convention
    return out, k.astype(jnp.float32), v.astype(jnp.float32)


# ----------------------------- pure-JAX reference --------------------------- #

def gpt2_attention_ref(params, x, last_key, last_value, num_heads):
    S, Hdim = x.shape
    D = Hdim // num_heads
    prev_seq = last_key.shape[1]
    qkv = x @ params["c_attn_w"] + params["c_attn_b"]
    q, k, v = jnp.split(qkv, 3, axis=-1)
    q = q.reshape(S, num_heads, D).transpose(1, 0, 2)
    k = k.reshape(S, num_heads, D).transpose(1, 0, 2)
    v = v.reshape(S, num_heads, D).transpose(1, 0, 2)
    kk = jnp.concatenate([last_key, k], axis=1)
    vv = jnp.concatenate([last_value, v], axis=1)
    s = jnp.einsum("hqd,hkd->hqk", q, kk) / math.sqrt(D)
    row = jnp.arange(S)[:, None]
    col = jnp.arange(S + prev_seq)[None, :]
    mask = jnp.where(col <= row + prev_seq, 0.0, jnp.finfo(jnp.float32).min)
    p = jax.nn.softmax(s + mask[None], axis=-1)
    o = jnp.einsum("hqk,hkd->hqd", p, vv).transpose(1, 0, 2).reshape(S, Hdim)
    o = o @ params["c_proj_w"] + params["c_proj_b"]
    return o, k, v


# ----------------------------- main ----------------------------------------- #

if __name__ == "__main__":
    # small config consistent with the module's shape relations
    seq = 8
    prev_seq = 8
    hidden = 32
    num_heads = 4
    head_dim = hidden // num_heads

    key = jax.random.PRNGKey(0)
    k_param, k_x, k_lk, k_lv = jax.random.split(key, 4)

    params = init_params(k_param, hidden)
    prepared = prepare_params(params, num_heads)
    hidden_states = jax.random.normal(k_x, (seq, hidden), jnp.float32)
    last_key = jax.random.normal(k_lk, (num_heads, prev_seq, head_dim), jnp.float32)
    last_value = jax.random.normal(k_lv, (num_heads, prev_seq, head_dim), jnp.float32)

    out, new_k, new_v = gpt2_attention(prepared, hidden_states, last_key,
                                       last_value, num_heads)
    out = jax.block_until_ready(out)
    new_k = jax.block_until_ready(new_k)
    new_v = jax.block_until_ready(new_v)

    ref_out, ref_k, ref_v = gpt2_attention_ref(
        params, hidden_states, last_key, last_value, num_heads)

    assert out.shape == (seq, hidden)
    assert new_k.shape == (num_heads, seq, head_dim)
    assert new_v.shape == (num_heads, seq, head_dim)
    # bf16 MXU matmuls + bf16 qkv/kv-cache + approx reciprocal -> bf16-level tolerance
    assert jnp.allclose(out, ref_out, rtol=2e-2, atol=2e-2), \
        float(jnp.max(jnp.abs(out - ref_out)))
    assert jnp.allclose(new_k, ref_k, rtol=2e-2, atol=2e-2)
    assert jnp.allclose(new_v, ref_v, rtol=2e-2, atol=2e-2)

    print("KERNEL_OK")
</pallas_src>

<mosaic_0001>
module attributes {stable_mosaic.version = 11 : i64} {
  func.func @_linear_kernel_bf16_out(%arg0: i32, %arg1: i32, %arg2: i32, %arg3: memref<8x32xf32, #tpu.memory_space<vmem>>, %arg4: memref<32x96xbf16, #tpu.memory_space<vmem>>, %arg5: memref<1x96xf32, #tpu.memory_space<vmem>>, %arg6: memref<8x96xbf16, #tpu.memory_space<vmem>>, %arg7: memref<8x96xf32, #tpu.memory_space<vmem>>) attributes {dimension_semantics = [#tpu.dimension_semantics<parallel>, #tpu.dimension_semantics<parallel>, #tpu.dimension_semantics<arbitrary>], iteration_bounds = array<i64: 1, 1, 1>, scalar_prefetch = 0 : i64, scratch_operands = 1 : i64, tpu.core_type = #tpu.core_type<tc>, window_params = [{transform_indices = @transform_0, window_bounds = array<i64: 8, 32>}, {transform_indices = @transform_1, window_bounds = array<i64: 32, 96>}, {transform_indices = @transform_2, window_bounds = array<i64: 1, 96>}, {transform_indices = @transform_3, window_bounds = array<i64: 8, 96>}]} {
    %c0_i32 = arith.constant 0 : i32
    %0 = arith.cmpi eq, %arg2, %c0_i32 : i32
    %1 = arith.extui %0 : i1 to i32
    %c0_i32_0 = arith.constant 0 : i32
    %2 = arith.cmpi ne, %1, %c0_i32_0 : i32
    scf.if %2 {
      %cst_10 = arith.constant 0.000000e+00 : f32
      %13 = vector.broadcast %cst_10 : f32 to vector<8x96xf32>
      %c0_11 = arith.constant 0 : index
      %c0_12 = arith.constant 0 : index
      %14 = vector.load %arg7[%c0_11, %c0_12] : memref<8x96xf32, #tpu.memory_space<vmem>>, vector<8x96xf32>
      tpu.vector_store %arg7[%c0_11, %c0_12], %13 {strides = array<i32>} : memref<8x96xf32, #tpu.memory_space<vmem>>, vector<8x96xf32>,
    } else {
    }
    %c0 = arith.constant 0 : index
    %c0_1 = arith.constant 0 : index
    %3 = vector.load %arg7[%c0, %c0_1] : memref<8x96xf32, #tpu.memory_space<vmem>>, vector<8x96xf32>
    %c0_2 = arith.constant 0 : index
    %c0_3 = arith.constant 0 : index
    %4 = vector.load %arg3[%c0_2, %c0_3] : memref<8x32xf32, #tpu.memory_space<vmem>>, vector<8x32xf32>
    %5 = arith.truncf %4 : vector<8x32xf32> to vector<8x32xbf16>
    %c0_4 = arith.constant 0 : index
    %c0_5 = arith.constant 0 : index
    %6 = vector.load %arg4[%c0_4, %c0_5] : memref<32x96xbf16, #tpu.memory_space<vmem>>, vector<32x96xbf16>
    %cst = arith.constant dense<0.000000e+00> : vector<8x96xf32>
    %7 = tpu.matmul %5, %6, %cst {dimension_numbers = #tpu.dot_dimension_numbers<[1], [0], [0], [1], [0, 0, 1, 1], [], []>} : vector<8x32xbf16>, vector<32x96xbf16>, vector<8x96xf32> -> vector<8x96xf32>
    %8 = arith.addf %3, %7 : vector<8x96xf32>
    %c0_6 = arith.constant 0 : index
    %c0_7 = arith.constant 0 : index
    %9 = vector.load %arg7[%c0_6, %c0_7] : memref<8x96xf32, #tpu.memory_space<vmem>>, vector<8x96xf32>
    tpu.vector_store %arg7[%c0_6, %c0_7], %8 {strides = array<i32>} : memref<8x96xf32, #tpu.memory_space<vmem>>, vector<8x96xf32>,
    %c0_i32_8 = arith.constant 0 : i32
    %10 = arith.cmpi eq, %arg2, %c0_i32_8 : i32
    %11 = arith.extui %10 : i1 to i32
    %c0_i32_9 = arith.constant 0 : i32
    %12 = arith.cmpi ne, %11, %c0_i32_9 : i32
    scf.if %12 {
      %c0_10 = arith.constant 0 : index
      %c0_11 = arith.constant 0 : index
      %13 = vector.load %arg7[%c0_10, %c0_11] : memref<8x96xf32, #tpu.memory_space<vmem>>, vector<8x96xf32>
      %c0_12 = arith.constant 0 : index
      %c0_13 = arith.constant 0 : index
      %14 = vector.load %arg5[%c0_12, %c0_13] : memref<1x96xf32, #tpu.memory_space<vmem>>, vector<1x96xf32>
      %15 = vector.broadcast %14 : vector<1x96xf32> to vector<8x96xf32>
      %16 = arith.addf %13, %15 : vector<8x96xf32>
      %17 = arith.truncf %16 : vector<8x96xf32> to vector<8x96xbf16>
      %c0_14 = arith.constant 0 : index
      %c0_15 = arith.constant 0 : index
      %18 = vector.load %arg6[%c0_14, %c0_15] : memref<8x96xbf16, #tpu.memory_space<vmem>>, vector<8x96xbf16>
      tpu.vector_store %arg6[%c0_14, %c0_15], %17 {strides = array<i32>} : memref<8x96xbf16, #tpu.memory_space<vmem>>, vector<8x96xbf16>,
    } else {
    }
    return
  }
  func.func @transform_0(%arg0: i32, %arg1: i32, %arg2: i32) -> (i32, i32) {
    %c0_i32 = arith.constant 0 : i32
    return %arg0, %arg2 : i32, i32
  }
  func.func @transform_1(%arg0: i32, %arg1: i32, %arg2: i32) -> (i32, i32) {
    %c0_i32 = arith.constant 0 : i32
    return %arg2, %arg1 : i32, i32
  }
  func.func @transform_2(%arg0: i32, %arg1: i32, %arg2: i32) -> (i32, i32) {
    %c0_i32 = arith.constant 0 : i32
    %c0_i32_0 = arith.constant 0 : i32
    return %c0_i32, %arg1 : i32, i32
  }
  func.func @transform_3(%arg0: i32, %arg1: i32, %arg2: i32) -> (i32, i32) {
    %c0_i32 = arith.constant 0 : i32
    return %arg0, %arg1 : i32, i32
  }
}

</mosaic_0001>

<bundles_post_ra>
// kernel: tpu_custom_call.1
= control target key start
LH: loop header
LB: loop body
LE: loop exit
PB: predicated region body
PF: predicated region fallthrough
CT: control target
= control target key end

     0   :  { %8 = vsyncpa [#allocation4], 0  ;;  %s255_s0 = inlined_call_operand.hbm [shape: f32[8,32], index: 0, kind: input, shape index: {}]   ;;  %s256_s1 = inlined_call_operand.hbm [shape: bf16[32,96], index: 1, kind: input, shape index: {}]   ;;  %s257_s2 = inlined_call_operand.vmem [shape: f32[1,96], index: 2, kind: input, shape index: {}]   ;;  %s258_s3 = inlined_call_operand.hbm [shape: bf16[8,96], index: 3, kind: output, shape index: {}]  }
   0x1   :  { %9 = vsyncpa [#allocation7], 0 }
   0x2   :  { %10 = vsyncpa [#allocation5], 0  ;;  %s16_s14 = sshll.u32 %s255_s0, 4  ;;  %s217_s15 = smov [#allocation3]   ;;  %s17_s14 = int_to_ptr.hbm [resolvable:$true] %s16_s14 }
   0x3   :  { %s18_s16 = sshll.u32 %s217_s15, 4  ;;  %s26_s19 = sshll.u32 %s256_s1, 4  ;;  %s19_s16 = int_to_ptr.vmem [resolvable:$true] %s18_s16  ;;  %s27_s19 = int_to_ptr.hbm [resolvable:$true] %s26_s19 }
   0x4   :  { %21 = dma.hbm_to_vmem [thread:$0]  %s17_s14, 128, %s19_s16, [#allocation4]  }
   0x5   :  { %s218_s20 = smov [#allocation6]   ;;  %s219_s22 = smov 64  }
   0x6   :  { %s28_s21 = sshll.u32 %s218_s20, 4  ;;  %s220_s23 = smov 4   ;;  %s29_s21 = int_to_ptr.vmem [resolvable:$true] %s28_s21 }
   0x7   :  { %34 = dma.hbm_to_vmem [thread:$0]  %s27_s19, 256, %s29_s21, [#allocation7], %s219_s22, %s219_s22, %s220_s23  }
   0x8   :  { %211 = dma.done.wait [#allocation4], 128  }
   0x9   :  { %212 = vsyncadd [#allocation4], 4294967168 }
   0xa   :  { %213 = dma.done.wait [#allocation7], 256  }
   0xb   :  { %214 = vsyncadd [#allocation7], 4294967040  ;;  %vm50_vm0 = vcmask 785408   ;;  %v221_v0 = vmov 0.0   ;;  %v131_v1 = vld [vmem:[#allocation6 + $0x8] sm:$0xff]  ;;  %v130_v2 = vld [vmem:[#allocation6] sm:$0xff] }
   0xc   :  { %51 = vst.msk [vmem:[#allocation2] sm:$0xff] %vm50_vm0, %v221_v0  ;;  %81 = vmatpush.bf16.msra.mxu0 %v131_v1  ;;  %v53_v3 = vld [vmem:[#allocation3] sm:$0xff]  ;;  %vm71_vm1 = vcmask 261120   ;;  %v138_v8 = vld [vmem:[%s257_s2] ss:$0 sm:$0xff]  ;;  %s222_s24 = smov [#allocation8]  }
   0xd   :  { %v54_v4 = vpack.c.bf16 %v53_v3, %v53_v3  ;;  %s108_s25 = sshll.u32 %s222_s24, 4  ;;  %s110_s28 = sshll.u32 %s258_s3, 4  ;;  %vm101_vm2 = vcmask 781312   ;;  %s109_s25 = int_to_ptr.vmem [resolvable:$true] %s108_s25  ;;  %s111_s28 = int_to_ptr.hbm [resolvable:$true] %s110_s28 }
  0x10   :  { %82 = vmatpush.bf16.msra.mxu0 %v130_v2 }
  0x13   :  { %129 = vmatmul.msk.bf16.vlgmr.msra.gmra.mxu0 %vm71_vm1, %v54_v4  ;;  %v52_v5 = vld [vmem:[#allocation2] sm:$0xff] }
  0x90   :  { %v84_v6 = vpop.f32.mrf.mxu0 }
  0x91   :  { %v88_v7 = vadd.f32 %v84_v6, %v52_v5 }
  0x93   :  { %90 = vst.msk [vmem:[#allocation2] sm:$0xff] %vm50_vm0, %v88_v7 }
  0x98   :  { %v86_v9 = vpop.f32.mrf.mxu0 }
  0x9a   :  { %v94_v10 = vld [vmem:[#allocation2] sm:$0xff] }
  0x9b   :  { %v99_v11 = vadd.f32 %v138_v8, %v94_v10 }
  0x9d   :  { %v100_v12 = vpack.c.bf16 %v99_v11, %v99_v11 }
  0x9f   :  { %102 = vst.msk [vmem:[#allocation8] sm:$0xf] %vm101_vm2, %v100_v12 }
  0xa0   :  { %113 = dma.vmem_to_hbm [thread:$0]  %s109_s25, 64, %s111_s28, [#allocation5]  }
  0xa1   :  { %215 = dma.done.wait [#allocation5], 64  }
  0xa2   :  { %216 = vsyncadd [#allocation5], 4294967232 }
  0xa3   :  { %118 = vsyncpa [#allocation4], 1 }
  0xa4   :  { %119 = vsyncpa [#allocation7], 1 }
  0xa5   :  { %120 = vsyncpa [#allocation5], 1 }

</bundles_post_ra>
